<compile_context>
chip_gen: v7x
topology: tpu7x:2x2x1
jax: 0.10.0
libtpu: 0.0.40
codegen_flags: <defaults>
</compile_context>

<pallas_src>
import jax
import jax.numpy as jnp
from jax.experimental import pallas as pl
from jax.experimental.pallas import tpu as pltpu

# Module hyper-parameters (from the PyTorch source)
N_HEAD = 6
N_EMBED = 64 * N_HEAD          # 384 = channel dim C
HEAD_SIZE = 64                 # head_size H
DROPOUT = 0.2                  # TODO(synk): dropout implemented as identity (eval mode);
                               #             training-mode Bernoulli masking not emitted.

# Large finite negative: identical softmax result to -inf for causal rows
# (every row has >=1 unmasked element), but NaN-safe if that ever changes.
_MASK_VALUE = -1e30


def _head_kernel(x_ref, wkqv_ref, o_ref):
    # x_ref: (T, C) VMEM tile for one batch element (leading batch dim squeezed)
    # wkqv_ref: (C, 3H) fused [K | Q*scale | V] projection weight (resident)
    # o_ref: (T, H) output tile
    H = o_ref.shape[-1]
    x = x_ref[...]                                   # (T, C), compute dtype (bf16 or f32)
    dt = x.dtype

    # Single wide projection matmul on the MXU, f32 accumulation.
    kqv = jnp.dot(x, wkqv_ref[...], preferred_element_type=jnp.float32)   # (T, 3H) f32
    k = kqv[:, :H]                                   # (T, H)
    q = kqv[:, H:2 * H]                              # (T, H)  (1/sqrt(C) already folded in)
    v = kqv[:, 2 * H:]                               # (T, H)

    # Attention scores: contract over the shared head dim — no explicit k.T.
    wei = jax.lax.dot_general(
        q.astype(dt), k.astype(dt),
        (((1,), (1,)), ((), ())),
        preferred_element_type=jnp.float32,
    )                                                # (T, T) f32

    # Causal mask: col > row  ->  masked.
    T = wei.shape[0]
    row = jax.lax.broadcasted_iota(jnp.int32, (T, T), 0)
    col = jax.lax.broadcasted_iota(jnp.int32, (T, T), 1)
    wei = jnp.where(col <= row, wei, _MASK_VALUE)

    # Numerically stable softmax, strictly f32 on the VPU/EUP.
    m = jnp.max(wei, axis=-1, keepdims=True)
    e = jnp.exp(wei - m)
    s = jnp.sum(e, axis=-1, keepdims=True)
    p = e * pl.reciprocal(s, approx=True)            # EUP reciprocal + VALU mul

    # Dropout on the attention matrix is identity in eval mode.
    out = jnp.dot(p.astype(dt), v.astype(dt), preferred_element_type=jnp.float32)  # (T, H)
    o_ref[...] = out.astype(o_ref.dtype)


def head_forward(x, w_key, w_query, w_value, *, compute_dtype=jnp.bfloat16):
    """x: (B, T, C); w_*: (C, H) (pre-transposed PyTorch Linear weights, no bias).

    compute_dtype controls the MXU operand dtype (bf16 recommended on v5e/v6e/v7x);
    accumulation and all softmax math stay in float32. Output dtype matches x.
    """
    B, T, C = x.shape
    H = w_key.shape[1]

    # Fold the reference's 1/sqrt(C) (= 1/sqrt(n_embed), NOT 1/sqrt(head_size) —
    # matching the PyTorch code exactly) into the query projection, and fuse the
    # three projections into one (C, 3H) weight.
    scale = jnp.float32(C) ** -0.5
    w_kqv = jnp.concatenate(
        [w_key.astype(jnp.float32), w_query.astype(jnp.float32) * scale,
         w_value.astype(jnp.float32)], axis=1)                      # (C, 3H)

    x_in = x.astype(compute_dtype)
    w_in = w_kqv.astype(compute_dtype)

    flops = 2 * B * T * C * (3 * H) + 4 * B * T * T * H
    cost = pl.CostEstimate(
        flops=flops,
        transcendentals=B * T * T,
        bytes_accessed=(x_in.size * x_in.dtype.itemsize
                        + w_in.size * w_in.dtype.itemsize
                        + B * T * H * x.dtype.itemsize),
    )

    return pl.pallas_call(
        _head_kernel,
        out_shape=jax.ShapeDtypeStruct((B, T, H), x.dtype),
        grid_spec=pltpu.PrefetchScalarGridSpec(
            num_scalar_prefetch=0,
            grid=(B,),
            in_specs=[
                # Per-batch x tile; leading batch dim squeezed away in the kernel.
                pl.BlockSpec((pl.Squeezed(), T, C), lambda b: (b, 0, 0)),
                # Fused projection weight, resident across the whole grid.
                pl.BlockSpec((C, 3 * H), lambda b: (0, 0)),
            ],
            out_specs=pl.BlockSpec((pl.Squeezed(), T, H), lambda b: (b, 0, 0)),
        ),
        compiler_params=pltpu.CompilerParams(
            dimension_semantics=("parallel",),   # batch axis shards across TCs on v7x
        ),
        cost_estimate=cost,
    )(x_in, w_in)


def head_reference(x, w_key, w_query, w_value):
    """Pure-JAX reference mirroring the PyTorch forward (eval mode), f32."""
    B, T, C = x.shape
    k = x @ w_key
    q = x @ w_query
    v = x @ w_value
    wei = (q @ jnp.swapaxes(k, -2, -1)) / (C ** 0.5)
    mask = jnp.tril(jnp.ones((T, T), dtype=bool))
    wei = jnp.where(mask, wei, -jnp.inf)
    wei = jax.nn.softmax(wei, axis=-1)
    return wei @ v


if __name__ == "__main__":
    key = jax.random.PRNGKey(0)
    k_x, k_k, k_q, k_v = jax.random.split(key, 4)

    B, T, C, H = 2, 8, N_EMBED, HEAD_SIZE   # small seq, module-consistent channel dim

    x = jax.random.normal(k_x, (B, T, C), dtype=jnp.float32)
    # Deterministic "Linear(bias=False)" weights, stored as (C, H) = W^T.
    scale = 1.0 / (C ** 0.5)
    w_key = jax.random.uniform(k_k, (C, H), minval=-scale, maxval=scale, dtype=jnp.float32)
    w_query = jax.random.uniform(k_q, (C, H), minval=-scale, maxval=scale, dtype=jnp.float32)
    w_value = jax.random.uniform(k_v, (C, H), minval=-scale, maxval=scale, dtype=jnp.float32)

    ref = head_reference(x, w_key, w_query, w_value)

    # f32-operand path: tight check of the kernel math.
    out_f32 = head_forward(x, w_key, w_query, w_value, compute_dtype=jnp.float32)
    out_f32 = jax.block_until_ready(out_f32)
    assert out_f32.shape == (B, T, H)
    assert out_f32.dtype == x.dtype
    assert jnp.allclose(out_f32, ref, atol=5e-3, rtol=5e-3), "f32 path mismatch vs reference"

    # bf16-operand path (default, MXU-native on v5e/v6e/v7x): looser tolerance.
    out_bf16 = head_forward(x, w_key, w_query, w_value, compute_dtype=jnp.bfloat16)
    out_bf16 = jax.block_until_ready(out_bf16)
    assert out_bf16.shape == (B, T, H)
    assert jnp.allclose(out_bf16, ref, atol=3e-2, rtol=3e-2), "bf16 path mismatch vs reference"

    print("KERNEL_OK")
</pallas_src>

<mosaic_0001>
module attributes {stable_mosaic.version = 11 : i64} {
  func.func @_head_kernel(%arg0: i32, %arg1: memref<1x8x384xf32, #tpu.memory_space<vmem>>, %arg2: memref<384x192xf32, #tpu.memory_space<vmem>>, %arg3: memref<1x8x64xf32, #tpu.memory_space<vmem>>) attributes {dimension_semantics = [#tpu.dimension_semantics<parallel>], iteration_bounds = array<i64: 2>, scalar_prefetch = 0 : i64, scratch_operands = 0 : i64, tpu.core_type = #tpu.core_type<tc>, window_params = [{transform_indices = @transform_0, window_bounds = array<i64: 1, 8, 384>}, {pipeline_mode = #tpu.pipeline_mode<synchronous>, transform_indices = @transform_1, window_bounds = array<i64: 384, 192>}, {transform_indices = @transform_2, window_bounds = array<i64: 1, 8, 64>}]} {
    %c0 = arith.constant 0 : index
    %c0_0 = arith.constant 0 : index
    %c0_1 = arith.constant 0 : index
    %0 = vector.load %arg1[%c0, %c0_0, %c0_1] : memref<1x8x384xf32, #tpu.memory_space<vmem>>, vector<1x8x384xf32>
    %1 = vector.shape_cast %0 : vector<1x8x384xf32> to vector<8x384xf32>
    %c0_2 = arith.constant 0 : index
    %c0_3 = arith.constant 0 : index
    %2 = vector.load %arg2[%c0_2, %c0_3] : memref<384x192xf32, #tpu.memory_space<vmem>>, vector<384x192xf32>
    %cst = arith.constant dense<0.000000e+00> : vector<8x192xf32>
    %3 = tpu.matmul %1, %2, %cst {dimension_numbers = #tpu.dot_dimension_numbers<[1], [0], [0], [1], [0, 0, 1, 1], [], []>} : vector<8x384xf32>, vector<384x192xf32>, vector<8x192xf32> -> vector<8x192xf32>
    %4 = vector.extract_strided_slice %3 {offsets = [0, 0], sizes = [8, 64], strides = [1, 1]} : vector<8x192xf32> to vector<8x64xf32>
    %5 = vector.extract_strided_slice %3 {offsets = [0, 64], sizes = [8, 64], strides = [1, 1]} : vector<8x192xf32> to vector<8x64xf32>
    %6 = vector.extract_strided_slice %3 {offsets = [0, 128], sizes = [8, 64], strides = [1, 1]} : vector<8x192xf32> to vector<8x64xf32>
    %cst_4 = arith.constant dense<0.000000e+00> : vector<8x8xf32>
    %7 = tpu.matmul %5, %4, %cst_4 {dimension_numbers = #tpu.dot_dimension_numbers<[1], [1], [0], [0], [0, 0, 1, 0], [], []>} : vector<8x64xf32>, vector<8x64xf32>, vector<8x8xf32> -> vector<8x8xf32>
    %8 = tpu.iota {dimensions = array<i32: 0>} : vector<8x8xi32>
    %9 = tpu.iota {dimensions = array<i32: 1>} : vector<8x8xi32>
    %10 = arith.cmpi sle, %9, %8 : vector<8x8xi32>
    %cst_5 = arith.constant -1.000000e+30 : f32
    %11 = vector.broadcast %cst_5 : f32 to vector<8x8xf32>
    %12 = arith.select %10, %7, %11 : vector<8x8xi1>, vector<8x8xf32>
    %cst_6 = arith.constant dense<0xFF800000> : vector<8xf32>
    %13 = vector.multi_reduction <maximumf>, %12, %cst_6 [1] : vector<8x8xf32> to vector<8xf32>
    %14 = vector.shape_cast %13 : vector<8xf32> to vector<8x1xf32>
    %15 = vector.broadcast %14 : vector<8x1xf32> to vector<8x8xf32>
    %16 = arith.subf %12, %15 : vector<8x8xf32>
    %17 = math.exp %16 : vector<8x8xf32>
    %cst_7 = arith.constant dense<0.000000e+00> : vector<8xf32>
    %18 = vector.multi_reduction <add>, %17, %cst_7 [1] : vector<8x8xf32> to vector<8xf32>
    %19 = vector.shape_cast %18 : vector<8xf32> to vector<8x1xf32>
    %20 = tpu.reciprocal %19 {approx = true} : vector<8x1xf32> -> vector<8x1xf32>
    %21 = vector.broadcast %20 : vector<8x1xf32> to vector<8x8xf32>
    %22 = arith.mulf %17, %21 : vector<8x8xf32>
    %cst_8 = arith.constant dense<0.000000e+00> : vector<8x64xf32>
    %23 = tpu.matmul %22, %6, %cst_8 {dimension_numbers = #tpu.dot_dimension_numbers<[1], [0], [0], [1], [0, 0, 1, 1], [], []>} : vector<8x8xf32>, vector<8x64xf32>, vector<8x64xf32> -> vector<8x64xf32>
    %c0_9 = arith.constant 0 : index
    %c0_10 = arith.constant 0 : index
    %c0_11 = arith.constant 0 : index
    %24 = vector.load %arg3[%c0_9, %c0_10, %c0_11] : memref<1x8x64xf32, #tpu.memory_space<vmem>>, vector<1x8x64xf32>
    %25 = vector.shape_cast %24 : vector<1x8x64xf32> to vector<8x64xf32>
    %26 = vector.shape_cast %23 : vector<8x64xf32> to vector<1x8x64xf32>
    tpu.vector_store %arg3[%c0_9, %c0_10, %c0_11], %26 {strides = array<i32>} : memref<1x8x64xf32, #tpu.memory_space<vmem>>, vector<1x8x64xf32>,
    return
  }
  func.func @transform_0(%arg0: i32) -> (i32, i32, i32) {
    %c0_i32 = arith.constant 0 : i32
    %c0_i32_0 = arith.constant 0 : i32
    %c0_i32_1 = arith.constant 0 : i32
    return %arg0, %c0_i32, %c0_i32_0 : i32, i32, i32
  }
  func.func @transform_1(%arg0: i32) -> (i32, i32) {
    %c0_i32 = arith.constant 0 : i32
    %c0_i32_0 = arith.constant 0 : i32
    %c0_i32_1 = arith.constant 0 : i32
    return %c0_i32, %c0_i32_0 : i32, i32
  }
  func.func @transform_2(%arg0: i32) -> (i32, i32, i32) {
    %c0_i32 = arith.constant 0 : i32
    %c0_i32_0 = arith.constant 0 : i32
    %c0_i32_1 = arith.constant 0 : i32
    return %arg0, %c0_i32, %c0_i32_0 : i32, i32, i32
  }
}

</mosaic_0001>

<bundles_post_ra>
// kernel: tpu_custom_call.1
= control target key start
LH: loop header
LB: loop body
LE: loop exit
PB: predicated region body
PF: predicated region fallthrough
CT: control target
= control target key end

     0   :  { %7 = vsyncpa [#allocation3], 0  ;;  %s1292_s0 = inlined_call_operand.vmem [shape: f32[2,8,384], index: 0, kind: input, shape index: {}]   ;;  %s1293_s1 = inlined_call_operand.vmem [shape: f32[384,192], index: 1, kind: input, shape index: {}]   ;;  %s1294_s2 = inlined_call_operand.hbm [shape: f32[2,8,64], index: 2, kind: output, shape index: {}]  }
   0x1   :  { %9 = vsyncpa [#allocation3 + $0x1], 0  ;;  %s881_s9 = smov 0   ;;  %s883_s10 = smov 0  }
   0x2   :  { %s885_s11 = smov 0   ;;  %s887_s12 = smov 0  }
   0x3 LB: > { %s902_s13 = sadd.s32 4294967295, %s860_s12   ;;  %s626_s14 = sadd.s32 4294967294, %s860_s12   ;;  %s860_s12 = sphi %s887_s12, %s1300_s12   ;;  %s856_s11 = sphi %s885_s11, %s1299_s11   ;;  %s852_s10 = sphi %s883_s10, %s1298_s10   ;;  %s848_s9 = sphi %s881_s9, %s1297_s9  }
   0x4   : > { %s906_s15 = sadd.s32 1, %s860_s12   ;;  %s69_s16 = sadd.s32 1, %s856_s11 }
   0x5   : > { %s66_s17 = ssub.s32 %s860_s12, %s906_s15  ;;  %p79_p0 = scmp.ne.s32.totalorder %s856_s11, %s852_s10 }
   0x6   : > { %p67_p1 = scmp.eq.s32.totalorder %s66_s17, 0  ;;  %p80_p2 = scmp.eq.s32.totalorder %s902_s13, 1 }
   0x7   : > { %p85_p3 = scmp.ne.s32.totalorder %s852_s10, %s848_s9  ;;  %p86_p4 = scmp.eq.s32.totalorder %s626_s14, 1 }
   0x8   : > { %s917_s18 = scalar_select %p67_p1, %s856_s11, %s69_s16  }
   0x9   : > { %p919_p5 = por %p80_p2, %p79_p0  ;;  %p923_p6 = por %p86_p4, %p85_p3 }
   0xa   : > { %p629_p7 = scmp.ge.s32.totalorder %s860_s12, 1  ;;  %p115_p8 = scmp.lt.s32.totalorder %s860_s12, 3 }
   0xc   : > { %p116_p9 = pnand %p629_p7, %p115_p8 }
   0xd   : > { %v146_v0 = vld [vmem:[%s1293_s1 + $0x8] sm:$0xff] (!%p116_p9)  ;;  %v148_v1 = vld [vmem:[%s1293_s1 + $0x18] sm:$0xff] (!%p116_p9)  ;;  %v145_v2 = vld [vmem:[%s1293_s1] sm:$0xff] (!%p116_p9)  ;;  %v862_v7 = vmov (!%p116_p9), 0.0   ;;  %p137_p10 = scmp.lt.s32.totalorder (!%p116_p9), %s902_s13, 1  ;;  %vm863_vm0 = vmmov (!%p116_p9), 0  }
   0xe   : > { %119 = sbr.rel (%p116_p9) target bundleno = 1162 (0x48a), region = 28  ;;  %v653_v3 = vpack.c.bf16 (!%p116_p9), %v148_v1, %v146_v0  ;;  %v147_v4 = vld [vmem:[%s1293_s1 + $0x10] sm:$0xff] (!%p116_p9)  ;;  %v150_v5 = vld [vmem:[%s1293_s1 + $0x28] sm:$0xff] (!%p116_p9)  ;;  %v152_v6 = vld [vmem:[%s1293_s1 + $0x38] sm:$0xff] (!%p116_p9)  ;;  %376 = vmatprep.mubr.f32.mxu1 (!%p116_p9), %v862_v7  ;;  %vm386_vm1 = vcmask (!%p116_p9), 523264   ;;  %s864_s3 = smov (!%p116_p9), 64  }
   0xf   : > { %v655_v8 = vpack.c.bf16 (!%p116_p9), %v147_v4, %v145_v2  ;;  %v657_v9 = vpack.c.bf16 (!%p116_p9), %v152_v6, %v150_v5  ;;  %v149_v10 = vld [vmem:[%s1293_s1 + $0x20] sm:$0xff] (!%p116_p9)  ;;  %v151_v11 = vld [vmem:[%s1293_s1 + $0x30] sm:$0xff] (!%p116_p9)  ;;  %v154_v12 = vld [vmem:[%s1293_s1 + $0x48] sm:$0xff] (!%p116_p9)  ;;  %vm467_vm3 = vcmask (!%p116_p9), 64512   ;;  %s636_s5 = sshll.u32 (!%p116_p9), %s902_s13, 7 }
  0x10   : > { %654 = vmatprep.subr.bf16.mxu0 (!%p116_p9), %v653_v3  ;;  %v156_v13 = vld [vmem:[%s1293_s1 + $0x58] sm:$0xff] (!%p116_p9)  ;;  %v659_v14 = vpack.c.bf16 (!%p116_p9), %v151_v11, %v149_v10  ;;  %v153_v16 = vld [vmem:[%s1293_s1 + $0x40] sm:$0xff] (!%p116_p9)  ;;  %v155_v17 = vld [vmem:[%s1293_s1 + $0x50] sm:$0xff] (!%p116_p9)  ;;  %s1249_s22 = scalar_lea.hbm (!%p116_p9), %s1294_s2, %s636_s5 }
  0x11   : > { %656 = vmatpush1.bf16.msra.mxu0 (!%p116_p9), %v655_v8  ;;  %v661_v15 = vpack.c.bf16 (!%p116_p9), %v156_v13, %v154_v12  ;;  %v158_v18 = vld [vmem:[%s1293_s1 + $0x68] sm:$0xff] (!%p116_p9)  ;;  %v160_v19 = vld [vmem:[%s1293_s1 + $0x78] sm:$0xff] (!%p116_p9)  ;;  %v663_v20 = vpack.c.bf16 (!%p116_p9), %v155_v17, %v153_v16  ;;  %v157_v22 = vld [vmem:[%s1293_s1 + $0x60] sm:$0xff] (!%p116_p9) }
  0x12   : > { %658 = vmatprep.subr.bf16.mxu0 (!%p116_p9), %v657_v9  ;;  %v665_v21 = vpack.c.bf16 (!%p116_p9), %v160_v19, %v158_v18  ;;  %v159_v23 = vld [vmem:[%s1293_s1 + $0x70] sm:$0xff] (!%p116_p9)  ;;  %v162_v24 = vld [vmem:[%s1293_s1 + $0x88] sm:$0xff] (!%p116_p9)  ;;  %v164_v25 = vld [vmem:[%s1293_s1 + $0x98] sm:$0xff] (!%p116_p9) }
  0x13   : > { %v210_v26 = vld [vmem:[%s1293_s1 + $0x208] sm:$0xff] (!%p116_p9)  ;;  %v212_v27 = vld [vmem:[%s1293_s1 + $0x218] sm:$0xff] (!%p116_p9)  ;;  %v667_v28 = vpack.c.bf16 (!%p116_p9), %v159_v23, %v157_v22  ;;  %v161_v29 = vld [vmem:[%s1293_s1 + $0x80] sm:$0xff] (!%p116_p9)  ;;  %v669_v33 = vpack.c.bf16 (!%p116_p9), %v164_v25, %v162_v24 }
  0x14   : > { %v717_v30 = vpack.c.bf16 (!%p116_p9), %v212_v27, %v210_v26  ;;  %v209_v31 = vld [vmem:[%s1293_s1 + $0x200] sm:$0xff] (!%p116_p9)  ;;  %v211_v32 = vld [vmem:[%s1293_s1 + $0x210] sm:$0xff] (!%p116_p9)  ;;  %v214_v36 = vld [vmem:[%s1293_s1 + $0x228] sm:$0xff] (!%p116_p9) }
  0x15   : > { %660 = vmatpush1.bf16.msra.mxu0 %v659_v14  ;;  %v163_v34 = vld [vmem:[%s1293_s1 + $0x90] sm:$0xff]  ;;  %v719_v35 = vpack.c.bf16 %v211_v32, %v209_v31  ;;  %v216_v37 = vld [vmem:[%s1293_s1 + $0x238] sm:$0xff]  ;;  %v166_v38 = vld [vmem:[%s1293_s1 + $0xa8] sm:$0xff]  ;;  %s1072_s14 = scalar_select %p137_p10, %s902_s13, 1 }
  0x16   : > { %662 = vmatprep.subr.bf16.mxu0 %v661_v15  ;;  %v168_v39 = vld [vmem:[%s1293_s1 + $0xb8] sm:$0xff]  ;;  %718 = vmatprep.subr.bf16.mxu1 %v717_v30  ;;  %v721_v40 = vpack.c.bf16 %v216_v37, %v214_v36  ;;  %v213_v41 = vld [vmem:[%s1293_s1 + $0x220] sm:$0xff]  ;;  %v215_v42 = vld [vmem:[%s1293_s1 + $0x230] sm:$0xff]  ;;  %v671_v43 = vpack.c.bf16 %v163_v34, %v161_v29  ;;  %s865_s13 = smov [#allocation2]  }
  0x17   : > { %720 = vmatpush1.bf16.msra.mxu1 %v719_v35  ;;  %v165_v44 = vld [vmem:[%s1293_s1 + $0xa0] sm:$0xff]  ;;  %v723_v45 = vpack.c.bf16 %v215_v42, %v213_v41  ;;  %v218_v46 = vld [vmem:[%s1293_s1 + $0x248] sm:$0xff]  ;;  %v220_v47 = vld [vmem:[%s1293_s1 + $0x258] sm:$0xff]  ;;  %v673_v48 = vpack.c.bf16 %v168_v39, %v166_v38  ;;  %s751_s7 = smul.u32 24, %s1072_s14 }
  0x18   : > { %722 = vmatprep.subr.bf16.mxu1 %v721_v40  ;;  %v167_v49 = vld [vmem:[%s1293_s1 + $0xb0] sm:$0xff]  ;;  %v725_v50 = vpack.c.bf16 %v220_v47, %v218_v46  ;;  %v217_v51 = vld [vmem:[%s1293_s1 + $0x240] sm:$0xff]  ;;  %v170_v53 = vld [vmem:[%s1293_s1 + $0xc8] sm:$0xff] }
  0x19   : > { %664 = vmatpush1.bf16.msra.mxu0 %v663_v20  ;;  %v219_v52 = vld [vmem:[%s1293_s1 + $0x250] sm:$0xff]  ;;  %v172_v54 = vld [vmem:[%s1293_s1 + $0xd8] sm:$0xff]  ;;  %v222_v55 = vld [vmem:[%s1293_s1 + $0x268] sm:$0xff]  ;;  %v675_v58 = vpack.c.bf16 %v167_v49, %v165_v44  ;;  %s1126_s8 = scalar_lea.vmem %s1292_s0, %s751_s7  ;;  %s802_s7 = sshll.u32 %s865_s13, 4  ;;  %s803_s7 = int_to_ptr.vmem [resolvable:$false] %s802_s7 }
  0x1a   : > { %666 = vmatprep.subr.bf16.mxu0 %v665_v21  ;;  %v727_v56 = vpack.c.bf16 %v219_v52, %v217_v51  ;;  %v224_v57 = vld [vmem:[%s1293_s1 + $0x278] sm:$0xff]  ;;  %v169_v59 = vld [vmem:[%s1293_s1 + $0xc0] sm:$0xff]  ;;  %v223_v62 = vld [vmem:[%s1293_s1 + $0x270] sm:$0xff]  ;;  %v677_v63 = vpack.c.bf16 %v172_v54, %v170_v53  ;;  %s804_s14 = scalar_lea.vmem %s803_s7, 256 }
  0x1b   : > { %724 = vmatpush1.bf16.msra.mxu1 %v723_v45  ;;  %v729_v60 = vpack.c.bf16 %v224_v57, %v222_v55  ;;  %v221_v61 = vld [vmem:[%s1293_s1 + $0x260] sm:$0xff]  ;;  %v171_v0 = vld [vmem:[%s1293_s1 + $0xd0] sm:$0xff]  ;;  %v226_v1 = vld [vmem:[%s1293_s1 + $0x288] sm:$0xff] }
  0x1c   : > { %726 = vmatprep.subr.bf16.mxu1 %v725_v50  ;;  %v228_v2 = vld [vmem:[%s1293_s1 + $0x298] sm:$0xff]  ;;  %v174_v3 = vld [vmem:[%s1293_s1 + $0xe8] sm:$0xff]  ;;  %v731_v5 = vpack.c.bf16 %v223_v62, %v221_v61  ;;  %v679_v6 = vpack.c.bf16 %v171_v0, %v169_v59  ;;  %v173_v8 = vld [vmem:[%s1293_s1 + $0xe0] sm:$0xff] }
  0x1d   : > { %668 = vmatpush1.bf16.msra.mxu0 %v667_v28  ;;  %v176_v4 = vld [vmem:[%s1293_s1 + $0xf8] sm:$0xff]  ;;  %v733_v9 = vpack.c.bf16 %v228_v2, %v226_v1  ;;  %v225_v10 = vld [vmem:[%s1293_s1 + $0x280] sm:$0xff]  ;;  %v227_v11 = vld [vmem:[%s1293_s1 + $0x290] sm:$0xff] }
  0x1e   : > { %670 = vmatprep.subr.bf16.mxu0 %v669_v33  ;;  %v681_v12 = vpack.c.bf16 %v176_v4, %v174_v3  ;;  %v175_v13 = vld [vmem:[%s1293_s1 + $0xf0] sm:$0xff]  ;;  %v230_v14 = vld [vmem:[%s1293_s1 + $0x2a8] sm:$0xff]  ;;  %v232_v15 = vld [vmem:[%s1293_s1 + $0x2b8] sm:$0xff]  ;;  %v735_v18 = vpack.c.bf16 %v227_v11, %v225_v10 }
  0x1f   : > { %728 = vmatpush1.bf16.msra.mxu1 %v727_v56  ;;  %v178_v16 = vld [vmem:[%s1293_s1 + $0x108] sm:$0xff]  ;;  %v180_v17 = vld [vmem:[%s1293_s1 + $0x118] sm:$0xff]  ;;  %v683_v19 = vpack.c.bf16 %v175_v13, %v173_v8  ;;  %v177_v20 = vld [vmem:[%s1293_s1 + $0x100] sm:$0xff]  ;;  %v737_v21 = vpack.c.bf16 %v232_v15, %v230_v14 }
  0x20   : > { %730 = vmatprep.subr.bf16.mxu1 %v729_v60  ;;  %v229_v22 = vld [vmem:[%s1293_s1 + $0x2a0] sm:$0xff]  ;;  %v231_v23 = vld [vmem:[%s1293_s1 + $0x2b0] sm:$0xff]  ;;  %v685_v24 = vpack.c.bf16 %v180_v17, %v178_v16  ;;  %v234_v26 = vld [vmem:[%s1293_s1 + $0x2c8] sm:$0xff] }
  0x21   : > { %672 = vmatpush1.bf16.msra.mxu0 %v671_v43  ;;  %v179_v25 = vld [vmem:[%s1293_s1 + $0x110] sm:$0xff]  ;;  %v236_v27 = vld [vmem:[%s1293_s1 + $0x2d8] sm:$0xff]  ;;  %v182_v28 = vld [vmem:[%s1293_s1 + $0x128] sm:$0xff]  ;;  %v739_v31 = vpack.c.bf16 %v231_v23, %v229_v22 }
  0x22   : > { %674 = vmatprep.subr.bf16.mxu0 %v673_v48  ;;  %v184_v29 = vld [vmem:[%s1293_s1 + $0x138] sm:$0xff]  ;;  %v181_v30 = vld [vmem:[%s1293_s1 + $0x120] sm:$0xff]  ;;  %v687_v32 = vpack.c.bf16 %v179_v25, %v177_v20  ;;  %v741_v33 = vpack.c.bf16 %v236_v27, %v234_v26  ;;  %v235_v35 = vld [vmem:[%s1293_s1 + $0x2d0] sm:$0xff] }
  0x23   : > { %732 = vmatpush1.bf16.msra.mxu1 %v731_v5  ;;  %v233_v34 = vld [vmem:[%s1293_s1 + $0x2c0] sm:$0xff]  ;;  %v143_v36 = vld [vmem:[%s1126_s8 + $0x8] sm:$0xff]  ;;  %v689_v37 = vpack.c.bf16 %v184_v29, %v182_v28  ;;  %v183_v38 = vld [vmem:[%s1293_s1 + $0x130] sm:$0xff]  ;;  %v461_v29 = vlaneseq }
  0x24   : > { %734 = vmatprep.subr.bf16.mxu1 %v733_v9  ;;  %v238_v39 = vld [vmem:[%s1293_s1 + $0x2e8] sm:$0xff]  ;;  %v240_v40 = vld [vmem:[%s1293_s1 + $0x2f8] sm:$0xff]  ;;  %305 = vmatprep.mubr.f32.mxu0 %v143_v36  ;;  %v743_v43 = vpack.c.bf16 %v235_v35, %v233_v34  ;;  %v691_v44 = vpack.c.bf16 %v183_v38, %v181_v30  ;;  %v237_v46 = vld [vmem:[%s1293_s1 + $0x2e0] sm:$0xff] }
  0x25   : > { %676 = vmatpush1.bf16.msra.mxu0 %v675_v58  ;;  %v186_v41 = vld [vmem:[%s1293_s1 + $0x148] sm:$0xff]  ;;  %v188_v42 = vld [vmem:[%s1293_s1 + $0x158] sm:$0xff]  ;;  %v745_v45 = vpack.c.bf16 %v240_v40, %v238_v39  ;;  %v239_v47 = vld [vmem:[%s1293_s1 + $0x2f0] sm:$0xff]  ;;  %v462_v30 = vshrl.u32 %v461_v29, 7 }
  0x26   : > { %678 = vmatprep.subr.bf16.mxu0 %v677_v63  ;;  %v693_v48 = vpack.c.bf16 %v188_v42, %v186_v41  ;;  %v185_v49 = vld [vmem:[%s1293_s1 + $0x140] sm:$0xff]  ;;  %v187_v50 = vld [vmem:[%s1293_s1 + $0x150] sm:$0xff]  ;;  %v190_v51 = vld [vmem:[%s1293_s1 + $0x168] sm:$0xff]  ;;  %v747_v53 = vpack.c.bf16 %v239_v47, %v237_v46 }
  0x27   : > { %736 = vmatpush1.bf16.msra.mxu1 %v735_v18  ;;  %v192_v52 = vld [vmem:[%s1293_s1 + $0x178] sm:$0xff]  ;;  %v695_v54 = vpack.c.bf16 %v187_v50, %v185_v49  ;;  %v189_v56 = vld [vmem:[%s1293_s1 + $0x160] sm:$0xff]  ;;  %v191_v57 = vld [vmem:[%s1293_s1 + $0x170] sm:$0xff] }
  0x28   : > { %738 = vmatprep.subr.bf16.mxu1 %v737_v21  ;;  %v697_v55 = vpack.c.bf16 %v192_v52, %v190_v51  ;;  %v194_v58 = vld [vmem:[%s1293_s1 + $0x188] sm:$0xff]  ;;  %v196_v59 = vld [vmem:[%s1293_s1 + $0x198] sm:$0xff]  ;;  %v144_v60 = vld [vmem:[%s1126_s8 + $0x10] sm:$0xff]  ;;  %v699_v61 = vpack.c.bf16 %v191_v57, %v189_v56 }
  0x29   : > { %680 = vmatpush1.bf16.msra.mxu0 %v679_v6  ;;  %v701_v62 = vpack.c.bf16 %v196_v59, %v194_v58  ;;  %v193_v63 = vld [vmem:[%s1293_s1 + $0x180] sm:$0xff]  ;;  %v195_v0 = vld [vmem:[%s1293_s1 + $0x190] sm:$0xff]  ;;  %v198_v1 = vld [vmem:[%s1293_s1 + $0x1a8] sm:$0xff] }
  0x2a   : > { %682 = vmatprep.subr.bf16.mxu0 %v681_v12  ;;  %v200_v2 = vld [vmem:[%s1293_s1 + $0x1b8] sm:$0xff]  ;;  %v703_v3 = vpack.c.bf16 %v195_v0, %v193_v63  ;;  %v197_v5 = vld [vmem:[%s1293_s1 + $0x1a0] sm:$0xff]  ;;  %v199_v6 = vld [vmem:[%s1293_s1 + $0x1b0] sm:$0xff] }
  0x2b   : > { %740 = vmatpush1.bf16.msra.mxu1 %v739_v31  ;;  %v705_v4 = vpack.c.bf16 %v200_v2, %v198_v1  ;;  %v202_v8 = vld [vmem:[%s1293_s1 + $0x1c8] sm:$0xff]  ;;  %v204_v9 = vld [vmem:[%s1293_s1 + $0x1d8] sm:$0xff]  ;;  %v707_v10 = vpack.c.bf16 %v199_v6, %v197_v5  ;;  %v201_v12 = vld [vmem:[%s1293_s1 + $0x1c0] sm:$0xff]  ;;  %v464_v31 = vand.u32 127, %v461_v29 }
  0x2c   : > { %742 = vmatprep.subr.bf16.mxu1 %v741_v33  ;;  %v709_v11 = vpack.c.bf16 %v204_v9, %v202_v8  ;;  %v203_v13 = vld [vmem:[%s1293_s1 + $0x1d0] sm:$0xff]  ;;  %v206_v14 = vld [vmem:[%s1293_s1 + $0x1e8] sm:$0xff]  ;;  %v208_v15 = vld [vmem:[%s1293_s1 + $0x1f8] sm:$0xff] }
  0x2d   : > { %684 = vmatpush1.bf16.msra.mxu0 %v683_v19  ;;  %v711_v16 = vpack.c.bf16 %v203_v13, %v201_v12  ;;  %v713_v17 = vpack.c.bf16 %v208_v15, %v206_v14  ;;  %v205_v18 = vld [vmem:[%s1293_s1 + $0x1e0] sm:$0xff]  ;;  %v207_v19 = vld [vmem:[%s1293_s1 + $0x1f0] sm:$0xff]  ;;  %vm465_vm2 = vcmp.le.s32.totalorder %v464_v31, %v462_v30 }
  0x2e   : > { %686 = vmatprep.subr.bf16.mxu0 %v685_v24  ;;  %v715_v20 = vpack.c.bf16 %v207_v19, %v205_v18  ;;  %v142_v21 = vld [vmem:[%s1126_s8] sm:$0xff]  ;;  %s134_s8 = sand.u32 1, %s852_s10  }
  0x2f   : > { %744 = vmatpush1.bf16.msra.mxu1 %v743_v43  ;;  %s630_s4 = sshll.u32 %s134_s8, 3  ;;  %s554_s23 = scalar_lea.sflag [#allocation3], %s134_s8 }
  0x30   : > { %746 = vmatprep.subr.bf16.mxu1 %v745_v45  ;;  %s136_s6 = scalar_lea.vmem [#allocation2], %s630_s4 }
  0x31   : > { %688 = vmatpush1.bf16.msra.mxu0 %v687_v32  ;;  %s567_s16 = sshll.u32 %s136_s6, 4  ;;  %s1251_s16 = int_to_ptr.vmem [resolvable:$true] %s567_s16 }
  0x32   : > { %690 = vmatprep.subr.bf16.mxu0 %v689_v37  ;;  %s798_s24 = scalar_lea.vmem %s1251_s16, 128  ;;  %p805_p0 = scmp.lt.s32.totalorder %s1251_s16, %s803_s7 }
  0x33   : > { %748 = vmatpush1.bf16.msra.mxu1 %v747_v53  ;;  %p799_p11 = scmp.ne.s32.totalorder %s1251_s16, %s798_s24  ;;  %p806_p1 = scmp.lt.s32.totalorder %s804_s14, %s798_s24 }
  0x34   : > { %643 = vmatprep.subr.mxu1 %v862_v7 }
  0x35   : > { %692 = vmatpush1.bf16.msra.mxu0 %v691_v44  ;;  %p800_p12 = pnand %p799_p11, %p919_p5  ;;  %p807_p2 = por %p806_p1, %p805_p0 }
  0x36   : > { %694 = vmatprep.subr.bf16.mxu0 %v693_v48  ;;  %377 = vmatmul.mubr.f32.vlgmr.msra.gmra.mrb[0].mxu1 %v144_v60 }
  0x37   : > { %645 = vmatprep.mubr.msk.f32.mxu1 %vm863_vm0, %v862_v7  ;;  %p801_p13 = pneg %p800_p12 }
  0x39   : > { %696 = vmatpush1.bf16.msra.mxu0 %v695_v54  ;;  %p808_p3 = pnand %p807_p2, %p801_p13 }
  0x3a   : > { %698 = vmatprep.subr.bf16.mxu0 %v697_v55 }
  0x3d   : > { %700 = vmatpush1.bf16.msra.mxu0 %v699_v61 }
  0x3e   : > { %702 = vmatprep.subr.bf16.mxu0 %v701_v62 }
  0x41   : > { %704 = vmatpush1.bf16.msra.mxu0 %v703_v3 }
  0x42   : > { %706 = vmatprep.subr.bf16.mxu0 %v705_v4 }
  0x45   : > { %708 = vmatpush1.bf16.msra.mxu0 %v707_v10 }
  0x46   : > { %710 = vmatprep.subr.bf16.mxu0 %v709_v11 }
  0x49   : > { %712 = vmatpush1.bf16.msra.mxu0 %v711_v16 }
  0x4a   : > { %714 = vmatprep.subr.bf16.mxu0 %v713_v17 }
  0x4d   : > { %716 = vmatpush1.bf16.msra.mxu0 %v715_v20 }
  0x50   : > { %306 = vmatmul.mubr.f32.vlgmr.msra.gmra.mrb[0].mxu0 %v142_v21 }
 0x109   : > { %v378_v22 = vpop.f32.mrb[0].mxu1 }
 0x10a   : > { %v380_v23 = vpop.f32.mrb[1].mxu1 }
 0x123   : > { %v307_v24 = vpop.f32.mrb[0].mxu0 }
 0x124   : > { %v379_v25 = vadd.f32 %v378_v22, %v307_v24  ;;  %v309_v26 = vpop.f32.mrb[1].mxu0 }
 0x125   : > { %v381_v27 = vadd.f32 %v380_v23, %v309_v26 }
 0x126   : > { %384 = vrot.lane.b32.xlu0 %v379_v25, %s864_s3  ;;  %644 = vmatpush3.xpose.msk.msra.mxu1 %vm386_vm1, %v379_v25 }
 0x127   : > { %648 = vmatprep.subr.mxu1 %v862_v7 }
 0x198   : > { %v385_v28 = vpop.permute.xlu0 %384 }
 0x199   : > { %646 = vmatmul.mubr.msk.f32.vlgmr.msra.gmra.mrb[2].mxu1 %vm386_vm1, %v385_v28 }
 0x19a   : > { %649 = vmatpush3.msra.mxu1 %v381_v27  ;;  %650 = vmatprep.mubr.msk.f32.mxu1 %vm863_vm0, %v862_v7 }
 0x26c   : > { %v457_v32 = vpop.f32.mrb[2].mxu1 }
 0x26d   : > { %v466_v33 = vsel %vm465_vm2, %v457_v32, -1e+30  ;;  %v647_v34 = vpop.f32.mrb[3].mxu1 }
 0x26e   : > { %v468_v35 = vsel %vm467_vm3, %v466_v33, -inf }
 0x26f   : > { %469 = vmax.xlane.f32.xlu0 %v468_v35 }
 0x2fc   : > { %v470_v36 = vpop.xlane.xlu0 %469 }
 0x2fd   : > { %v471_v37 = vsub.f32 %v466_v33, %v470_v36 }
 0x2ff   : > { %v472_v38 = vmul.f32 1.442695, %v471_v37 }
 0x301   : > { %794 = vpow2.f32 %v472_v38 }
 0x30b   : > { %v795_v39 = vpop.eup %794 }
 0x30c   : > { %v474_v7 = vsel %vm467_vm3, %v795_v39, 0.0 }
 0x30d   : > { %475 = vadd.xlane.f32.xlu1 %v474_v7 }
 0x39a   : > { %v476_v40 = vpop.xlane.xlu1 %475 }
 0x39b   : > { %796 = vrcp.f32 %v476_v40 }
 0x3a5   : > { %v797_v41 = vpop.eup %796 }
 0x3a6   : > { %v478_v42 = vmul.f32 %v797_v41, %v795_v39 }
 0x3a8   : > { %651 = vmatmul.mubr.msk.f32.vlgmr.msra.gmra.mrb[4].mxu1 %vm467_vm3, %v478_v42 }
 0x47b   : > { %v548_v43 = vpop.f32.mrb[4].mxu1 }
 0x47c   : > { %552 = vst.msk [vmem:[%s136_s6] sm:$0xff] %vm386_vm1, %v548_v43  ;;  %v652_v44 = vpop.f32.mrb[5].mxu1 }
 0x47d   : > { %811 = shalt.err (!%p808_p3)
}
 0x47e   : > { %s812_s25 = scalar_lea.hbm %s1249_s22, 128  ;;  %s816_s28 = scalar_lea.hbm %s1294_s2, 256 }
 0x47f   : > { %p813_p4 = scmp.ne.s32.totalorder %s1249_s22, %s812_s25  ;;  %p817_p9 = scmp.lt.u32.totalorder %s1249_s22, %s1294_s2 }
 0x480   : > { %p818_p10 = scmp.lt.u32.totalorder %s816_s28, %s812_s25  ;;  %p820_p12 = scmp.lt.u32.totalorder %s812_s25, %s1249_s22 }
 0x481   : > { %p814_p7 = pnand %p813_p4, %p919_p5 }
 0x482   : > { %p819_p11 = por %p818_p10, %p817_p9 }
 0x483   : > { %p815_p8 = pneg %p814_p7 }
 0x484   : > { %p821_p13 = por %p820_p12, %p819_p11 }
 0x486   : > { %p822_p0 = pnand %p821_p13, %p815_p8 }
 0x488   : > { %825 = shalt.err (!%p822_p0)
}
 0x489   : > { %752 = dma.vmem_to_hbm [thread:$0]  (%p919_p5), %s1251_s16, 128, %s1249_s22, %s554_s23  }
 0x48a PF: > { %p758_p1 = scmp.ge.s32.totalorder %s860_s12, 2  ;;  %s579_s3 = sand.u32 1, %s848_s9  }
 0x48b   : > { %s580_s8 = scalar_lea.sflag [#allocation3], %s579_s3 }
 0x48c   : > { %p755_p2 = pnand %p758_p1, %p923_p6 }
 0x48e   : > { %843 = dma.done.wait (!%p755_p2), %s580_s8, 128  }
 0x48f   : > { %845 = vsyncadd (!%p755_p2), %s580_s8, 4294967168  ;;  %p12_p3 = scmp.ge.s32.totalorder %s906_s15, 4   ;;  %s1297_s9 = smov %s852_s10 }
 0x490   : > { %s1298_s10 = smov %s856_s11  ;;  %s1299_s11 = smov %s917_s18 }
 0x491   : > { %s1300_s12 = smov %s906_s15  ;;  %14 = sbr.rel (!%p12_p3) target bundleno = 3 (0x3), region = 63 }
 0x498   :  { %585 = vsyncpa [#allocation3], 1 }
 0x499   :  { %587 = vsyncpa [#allocation3 + $0x1], 1 }

</bundles_post_ra>
